<compile_context>
chip_gen: v7x
topology: tpu7x:2x2x1
jax: 0.10.0
libtpu: 0.0.40
codegen_flags: <defaults>
</compile_context>

<pallas_src>
from dataclasses import dataclass
from functools import partial
from typing import Any, Tuple

import jax
import jax.numpy as jnp
from jax.experimental import pallas as pl
from jax.experimental.pallas import tpu as pltpu


# ---------------------------------------------------------------------------
# Minimal stand-ins for the CLRS "features" container so the wrapper can
# mirror `features[0].inputs[0].data.shape[0]` semantics.
# ---------------------------------------------------------------------------
@dataclass
class _DataPoint:
  data: Any


@dataclass
class _Features:
  inputs: Tuple[_DataPoint, ...]


def _round_up(x: int, m: int) -> int:
  return ((x + m - 1) // m) * m


# Tiling policy (columns == batch elements on the lane axis):
#   - cap each tile at 131072 columns: 10 * 131072 * 4 B ≈ 5.0 MiB per buffer,
#     ~10 MiB double-buffered -> fits every generation's scoped-VMEM default.
#   - once the padded batch exceeds 32768 columns, use an even grid >= 2 so
#     the parallel axis can shard across both v7x TensorCores.
_TILE_CAP_COLS = 131072
_MIN_SPLIT_COLS = 32768


def _compute_tiling(batch_size: int):
  """Returns (tile_b, grid_b, padded_b) with bounded per-tile padding."""
  padded_min = _round_up(batch_size, 128)
  if padded_min <= _MIN_SPLIT_COLS:
    grid_b = 1
    tile_b = padded_min
  else:
    # Choose the grid first (>= 2, even, enough tiles to stay under the cap),
    # then rebalance tile_b so padding waste is < 128 columns per tile.
    grid_b = max(2, pl.cdiv(padded_min, _TILE_CAP_COLS))
    if grid_b % 2:
      grid_b += 1
    tile_b = _round_up(pl.cdiv(batch_size, grid_b), 128)
  return tile_b, grid_b, grid_b * tile_b


# ---------------------------------------------------------------------------
# Pallas kernel: lane-broadcast the (10, 1) parameter column across a
# lane-dense (10, TILE_B) output tile (batch lives on the lane axis, so every
# store is a full-width vst rather than a 10/128 masked vst.msk).
# ---------------------------------------------------------------------------
def _dummy_net_kernel(param_ref, out_ref):
  # param_ref: (10, 1) in VMEM ; out_ref: (10, TILE_B) lane-dense tile.
  out_ref[...] = jnp.broadcast_to(param_ref[...], out_ref.shape)


@partial(jax.jit, static_argnames=("batch_size", "lane_dense"))
def dummy_net_forward(dummy_param: jax.Array, batch_size: int,
                      lane_dense: bool = False):
  """DummyNet forward on TPU via pallas_call.

  Args:
    dummy_param: (1, 10) parameter (dtype preserved in the output).
    batch_size:  static batch size B.
    lane_dense:  if True, return the kernel's (10, B) slab untransposed so the
                 consumer can absorb the layout (avoids a lane-padded (B, 10)
                 materialization).

  Returns:
    (dummy_output, dummy_hint):
      dummy_output is (B, 10) (or (10, B) if lane_dense) in dummy_param.dtype,
      dummy_hint is (B, 5) float32 zeros.
  """
  out_dtype = dummy_param.dtype

  # Guard the untested edge case: empty batch -> empty outputs, no kernel.
  if batch_size == 0:
    empty_out = (jnp.zeros((10, 0), out_dtype) if lane_dense
                 else jnp.zeros((0, 10), out_dtype))
    return empty_out, jnp.zeros((0, 5), jnp.float32)

  tile_b, grid_b, padded_b = _compute_tiling(batch_size)
  itemsize = jnp.dtype(out_dtype).itemsize

  param_col = dummy_param.reshape(1, 10).T  # (10, 1), dtype preserved

  out_t = pl.pallas_call(
      _dummy_net_kernel,
      out_shape=jax.ShapeDtypeStruct((10, padded_b), out_dtype),
      grid=(grid_b,),
      in_specs=[pl.BlockSpec((10, 1), lambda i: (0, 0))],
      out_specs=pl.BlockSpec((10, tile_b), lambda i: (0, i)),
      compiler_params=pltpu.CompilerParams(
          dimension_semantics=("parallel",)),
      cost_estimate=pl.CostEstimate(
          flops=0,
          transcendentals=0,
          bytes_accessed=10 * padded_b * itemsize + 10 * itemsize),
  )(param_col)

  if lane_dense:
    # Consumers that can contract/broadcast along the lane-dense layout skip
    # the transpose materialization entirely.
    dummy_output = out_t[:, :batch_size]
  else:
    # Layout plumbing in the wrapper (fused/handled by XLA): drop batch
    # padding and transpose back to PyTorch's (B, 10).
    dummy_output = out_t[:, :batch_size].T

  # Zero hint is a pure constant output — emit it in the wrapper so the kernel
  # never burns HBM writeback bandwidth on redundant zeros (torch.zeros -> f32).
  dummy_hint = jnp.zeros((batch_size, 5), dtype=jnp.float32)
  return dummy_output, dummy_hint


class DummyNetPallas:
  """JAX/Pallas equivalent of the PyTorch DummyNet module."""

  def __init__(self, key: jax.Array):
    # nn.Parameter(torch.randn(1, 10)) -> normal init (different RNG stream
    # than torch; bit-exact parity with a torch checkpoint is not required).
    self.dummy_param = jax.random.normal(key, (1, 10), dtype=jnp.float32)

  def __call__(self, features, repred, algorithm_index, return_hints,
               return_all_outputs):
    batch_size = int(features[0].inputs[0].data.shape[0])
    return dummy_net_forward(self.dummy_param, batch_size)


if __name__ == "__main__":
  key = jax.random.PRNGKey(0)
  k_param, k_data = jax.random.split(key)

  net = DummyNetPallas(k_param)

  # Small synthetic "features": batch=2, payload values irrelevant (only the
  # batch dim is read), matching the PyTorch module.
  batch = 2
  data = jax.random.normal(k_data, (batch, 4, 16), dtype=jnp.float32)
  features = [_Features(inputs=(_DataPoint(data=data),))]

  dummy_output, dummy_hint = net(
      features, repred=False, algorithm_index=0,
      return_hints=False, return_all_outputs=False)
  jax.block_until_ready((dummy_output, dummy_hint))

  # Correctness checks against reference semantics.
  ref_output = jnp.broadcast_to(net.dummy_param, (batch, 10))
  assert dummy_output.shape == (batch, 10)
  assert dummy_output.dtype == net.dummy_param.dtype
  assert dummy_hint.shape == (batch, 5)
  assert jnp.allclose(dummy_output, ref_output)
  assert jnp.all(dummy_hint == 0.0)

  # Lane-dense (transpose-free) path returns the same values, just (10, B).
  out_ld, hint_ld = dummy_net_forward(net.dummy_param, batch, lane_dense=True)
  jax.block_until_ready((out_ld, hint_ld))
  assert out_ld.shape == (10, batch)
  assert jnp.allclose(out_ld.T, ref_output)

  # Empty-batch guard.
  out0, hint0 = dummy_net_forward(net.dummy_param, 0)
  assert out0.shape == (0, 10) and hint0.shape == (0, 5)

  print("KERNEL_OK")
</pallas_src>

<mosaic_0001>
module attributes {stable_mosaic.version = 11 : i64} {
  func.func @_dummy_net_kernel(%arg0: i32, %arg1: memref<10x1xf32, #tpu.memory_space<vmem>>, %arg2: memref<10x128xf32, #tpu.memory_space<vmem>>) attributes {dimension_semantics = [#tpu.dimension_semantics<parallel>], iteration_bounds = array<i64: 1>, scalar_prefetch = 0 : i64, scratch_operands = 0 : i64, tpu.core_type = #tpu.core_type<tc>, window_params = [{pipeline_mode = #tpu.pipeline_mode<synchronous>, transform_indices = @transform_0, window_bounds = array<i64: 10, 1>}, {transform_indices = @transform_1, window_bounds = array<i64: 10, 128>}]} {
    %c0 = arith.constant 0 : index
    %c0_0 = arith.constant 0 : index
    %0 = vector.load %arg1[%c0, %c0_0] : memref<10x1xf32, #tpu.memory_space<vmem>>, vector<10x1xf32>
    %1 = vector.shape_cast %0 : vector<10x1xf32> to vector<10x1xf32>
    %2 = vector.broadcast %1 : vector<10x1xf32> to vector<10x128xf32>
    %c0_1 = arith.constant 0 : index
    %c0_2 = arith.constant 0 : index
    %3 = vector.load %arg2[%c0_1, %c0_2] : memref<10x128xf32, #tpu.memory_space<vmem>>, vector<10x128xf32>
    tpu.vector_store %arg2[%c0_1, %c0_2], %2 {strides = array<i32>} : memref<10x128xf32, #tpu.memory_space<vmem>>, vector<10x128xf32>,
    return
  }
  func.func @transform_0(%arg0: i32) -> (i32, i32) {
    %c0_i32 = arith.constant 0 : i32
    %c0_i32_0 = arith.constant 0 : i32
    %c0_i32_1 = arith.constant 0 : i32
    return %c0_i32, %c0_i32_0 : i32, i32
  }
  func.func @transform_1(%arg0: i32) -> (i32, i32) {
    %c0_i32 = arith.constant 0 : i32
    %c0_i32_0 = arith.constant 0 : i32
    return %c0_i32, %arg0 : i32, i32
  }
}

</mosaic_0001>

<bundles_post_ra>
// kernel: dummy_net_forward.1
= control target key start
LH: loop header
LB: loop body
LE: loop exit
PB: predicated region body
PF: predicated region fallthrough
CT: control target
= control target key end

     0   :  { %v28_v0 = vmov 0   ;;  %s51_s0 = inlined_call_operand.vmem [shape: f32[10,1], index: 0, kind: input, shape index: {}]   ;;  %s52_s1 = inlined_call_operand.vmem [shape: f32[10,128], index: 1, kind: output, shape index: {}]  }
   0x1   :  { %27 = vset.pattern.permute.xlu0 %v28_v0  ;;  %v8_v1 = vld [vmem:[%s51_s0] sm:$0xff]  ;;  %v9_v2 = vld [vmem:[%s51_s0 + $0x8] sm:$0x3] }
   0x2   :  { %12 = vperm.xlu0 %27, %v8_v1  }
   0x6   :  { %17 = vperm.xlu0 %27, %v9_v2  }
  0x81   :  { %v13_v3 = vpop.permute.xlu0 %12 }
  0x82   :  { %20 = vst [vmem:[%s52_s1] sm:$0xff] %v13_v3 }
  0x85   :  { %v18_v4 = vpop.permute.xlu0 %17 }
  0x86   :  { %21 = vst [vmem:[%s52_s1 + $0x8] sm:$0x3] %v18_v4 }

</bundles_post_ra>
